<compile_context>
chip_gen: v6e
topology: v6e:2x2x1
jax: 0.10.0
libtpu: 0.0.40
codegen_flags: <defaults>
</compile_context>

<pallas_src>
import jax
import jax.numpy as jnp
from jax import lax
from jax.experimental import pallas as pl
from jax.experimental.pallas import tpu as pltpu

# ----------------------------- model config ---------------------------------
NUM_CONCEPTS = 12                    # C
EMBED_SIZE   = 16                    # E
HIDDEN_DIM   = 32                    # H
BATCH        = 2                     # B
SEQ_LEN      = 8                     # S
VOCAB        = 2 * NUM_CONCEPTS + 1  # 2C + 1 interaction-embedding rows
BP           = 8                     # batch padded to a full sublane tile


# ------------------------------ Pallas kernel --------------------------------
def dkt_fused_kernel(q_ref, r_ref, emb_ref, wih_ref, b_ref, whh_ref,
                     wout_ref, bout_ref, out_ref, gx_buf, hs_buf):
    """Whole DKT forward (embedding + LSTM + output head) in one invocation.

    q_ref, r_ref: (B, S)   int32 questions / responses
    emb_ref:      (V, E)   interaction embedding table (V = 2C+1)
    wih_ref:      (E, 4H)  input->gate weights  (PyTorch W_ih^T, gate order ifgo)
    b_ref:        (1, 4H)  b_ih + b_hh
    whh_ref:      (H, 4H)  hidden->gate weights (PyTorch W_hh^T), bf16 storage
    wout_ref:     (H, C)   output-layer weight (PyTorch W^T)
    bout_ref:     (1, C)   output-layer bias
    out_ref:      (B, S, C) sigmoid(logits), batch-major
    gx_buf:       (S*BP, 4H) f32 VMEM scratch for hoisted input projection
    hs_buf:       (S*BP, H)  f32 VMEM scratch for per-step hidden states
    """
    B, S, H, C = BATCH, SEQ_LEN, HIDDEN_DIM, NUM_CONCEPTS

    # -------- Prologue (all off the serial chain) -----------------------------
    # Interaction index + fused embedding gather as an exact one-hot matmul.
    idx = q_ref[...] + C * r_ref[...]                                 # (B, S) i32
    iota_v = lax.broadcasted_iota(jnp.int32, (B, S, VOCAB), 2)
    onehot = (iota_v == idx[:, :, None]).astype(jnp.float32)          # (B, S, V)
    x = jnp.dot(onehot.reshape(B * S, VOCAB), emb_ref[...],
                preferred_element_type=jnp.float32)                   # (B*S, E)

    # Input projection for all time steps at once: Gx = x @ W_ih + b.
    gx = (jnp.dot(x, wih_ref[...], preferred_element_type=jnp.float32)
          + b_ref[...])                                               # (B*S, 4H)
    # Stage into a padded scratch (rows b*S + t; padded rows = zero gates).
    gx_buf[...] = jnp.zeros_like(gx_buf)
    gx_buf[0:B * S, :] = gx

    whh = whh_ref[...]                                                # (H,4H) bf16
    lane = lax.broadcasted_iota(jnp.int32, (BP, 4 * H), 1)
    is_g_lane = (lane >= 2 * H) & (lane < 3 * H)                      # tanh lanes

    # -------- Serial recurrence, statically unrolled over S --------------------
    # Only h_bf16 @ W_hh (one MXU op) + gate nonlinearity + c/h update stay on
    # the time-dependency chain.
    h = jnp.zeros((BP, H), jnp.float32)
    c = jnp.zeros((BP, H), jnp.float32)
    h_bf = h.astype(jnp.bfloat16)
    for t in range(S):
        # rows {b*S + t : b} -> aligned (BP, 4H) tile; independent of h, so the
        # scheduler can prefetch it off the chain.
        gx_t = gx_buf[pl.ds(t, BP, stride=S), :]
        z = gx_t + jnp.dot(h_bf, whh, preferred_element_type=jnp.float32)
        a = jnp.where(is_g_lane, jnp.tanh(z), jax.nn.sigmoid(z))      # i,f,g,o
        i_g = a[:, 0 * H:1 * H]
        f_g = a[:, 1 * H:2 * H]
        g_g = a[:, 2 * H:3 * H]
        o_g = a[:, 3 * H:4 * H]
        c = f_g * c + i_g * g_g
        h = o_g * jnp.tanh(c)
        h_bf = h.astype(jnp.bfloat16)
        hs_buf[t * BP:(t + 1) * BP, :] = h                            # aligned store

    # -------- Epilogue: per-batch output head (off the chain) ------------------
    wout = wout_ref[...]
    bout = bout_ref[...]
    for b in range(B):
        hs_b = hs_buf[pl.ds(b, S, stride=BP), :]                      # (S, H)
        logits = (jnp.dot(hs_b, wout, preferred_element_type=jnp.float32)
                  + bout)                                             # (S, C)
        out_ref[b, :, :] = jax.nn.sigmoid(logits).astype(out_ref.dtype)


def dkt_forward(questions, responses, params):
    """questions, responses: int32 [B, S] -> predictions f32 [B, S, C]."""
    B, S = questions.shape
    C, H = NUM_CONCEPTS, HIDDEN_DIM

    vmem = pl.BlockSpec(memory_space=pltpu.MemorySpace.VMEM)
    cost = pl.CostEstimate(flops=650_000, transcendentals=18_700,
                           bytes_accessed=21_000)

    out = pl.pallas_call(
        dkt_fused_kernel,
        out_shape=jax.ShapeDtypeStruct((B, S, C), jnp.float32),
        in_specs=[vmem] * 8,
        out_specs=vmem,
        scratch_shapes=[
            pltpu.VMEM((S * BP, 4 * H), jnp.float32),   # gx_buf
            pltpu.VMEM((S * BP, H), jnp.float32),       # hs_buf
        ],
        cost_estimate=cost,
    )(questions.astype(jnp.int32),
      responses.astype(jnp.int32),
      params["embedding"],
      params["w_ih"],
      params["b_gates"],
      params["w_hh_bf16"],
      params["w_out"],
      params["b_out"])
    return out                                                        # (B, S, C)


# ------------------------------ params / reference ----------------------------
def init_params(key):
    kE, k1, k2, k3, k4, k5, k6 = jax.random.split(key, 7)
    C, E, H = NUM_CONCEPTS, EMBED_SIZE, HIDDEN_DIM
    scale = 0.1
    emb = jax.random.normal(kE, (VOCAB, E), jnp.float32) * scale
    emb = emb.at[0].set(0.0)                               # padding_idx=0
    w_hh = jax.random.normal(k2, (H, 4 * H), jnp.float32) * scale
    params = {
        "embedding": emb,
        "w_ih": jax.random.normal(k1, (E, 4 * H), jnp.float32) * scale,
        "w_hh": w_hh,                                      # f32 (reference)
        "w_hh_bf16": w_hh.astype(jnp.bfloat16),            # kernel recurrence RHS
        "b_gates": (jax.random.normal(k3, (1, 4 * H), jnp.float32) * scale
                    + jax.random.normal(k4, (1, 4 * H), jnp.float32) * scale),
        "w_out": jax.random.normal(k5, (H, C), jnp.float32) * scale,
        "b_out": jax.random.normal(k6, (1, C), jnp.float32) * scale,
    }
    return params


def dkt_forward_ref(questions, responses, params):
    """Pure-JAX f32 reference (lax.scan LSTM) for validation."""
    H = HIDDEN_DIM
    idx = questions + NUM_CONCEPTS * responses
    x = jnp.take(params["embedding"], idx, axis=0)        # [B, S, E]

    def step(carry, x_t):
        h, c = carry
        gates = x_t @ params["w_ih"] + h @ params["w_hh"] + params["b_gates"][0]
        i = jax.nn.sigmoid(gates[:, 0 * H:1 * H])
        f = jax.nn.sigmoid(gates[:, 1 * H:2 * H])
        g = jnp.tanh(gates[:, 2 * H:3 * H])
        o = jax.nn.sigmoid(gates[:, 3 * H:4 * H])
        c = f * c + i * g
        h = o * jnp.tanh(c)
        return (h, c), h

    B = x.shape[0]
    h0 = jnp.zeros((B, H), jnp.float32)
    c0 = jnp.zeros((B, H), jnp.float32)
    _, hs = lax.scan(step, (h0, c0), jnp.transpose(x, (1, 0, 2)))  # [S, B, H]
    hs = jnp.transpose(hs, (1, 0, 2))                              # [B, S, H]
    return jax.nn.sigmoid(hs @ params["w_out"] + params["b_out"][0])


# ---------------------------------- main --------------------------------------
if __name__ == "__main__":
    key = jax.random.PRNGKey(0)
    kp, kq, kr = jax.random.split(key, 3)

    params = init_params(kp)
    # Concepts are 1-indexed so idx=0 is reserved for padding (padding_idx=0).
    questions = jax.random.randint(kq, (BATCH, SEQ_LEN), 1, NUM_CONCEPTS + 1,
                                   dtype=jnp.int32)
    responses = jax.random.randint(kr, (BATCH, SEQ_LEN), 0, 2, dtype=jnp.int32)

    pred = jax.jit(dkt_forward)(questions, responses, params)
    pred = jax.block_until_ready(pred)

    ref = jax.block_until_ready(dkt_forward_ref(questions, responses, params))
    assert pred.shape == (BATCH, SEQ_LEN, NUM_CONCEPTS)
    # bf16 storage of W_hh / h on the recurrence chain (per perf review) plus
    # EUP sigmoid/tanh approximations -> allow a slightly relaxed tolerance
    # against the pure-f32 reference.
    assert jnp.allclose(pred, ref, atol=5e-3, rtol=1e-3), "mismatch vs reference"

    print("KERNEL_OK")
</pallas_src>

<mosaic_0001>
module attributes {stable_mosaic.version = 11 : i64} {
  func.func @dkt_fused_kernel(%arg0: memref<2x8xi32, #tpu.memory_space<vmem>>, %arg1: memref<2x8xi32, #tpu.memory_space<vmem>>, %arg2: memref<25x16xf32, #tpu.memory_space<vmem>>, %arg3: memref<16x128xf32, #tpu.memory_space<vmem>>, %arg4: memref<1x128xf32, #tpu.memory_space<vmem>>, %arg5: memref<32x128xbf16, #tpu.memory_space<vmem>>, %arg6: memref<32x12xf32, #tpu.memory_space<vmem>>, %arg7: memref<1x12xf32, #tpu.memory_space<vmem>>, %arg8: memref<2x8x12xf32, #tpu.memory_space<vmem>>, %arg9: memref<64x128xf32, #tpu.memory_space<vmem>>, %arg10: memref<64x32xf32, #tpu.memory_space<vmem>>) attributes {dimension_semantics = [], scalar_prefetch = 0 : i64, scratch_operands = 2 : i64, tpu.core_type = #tpu.core_type<tc>} {
    %c0 = arith.constant 0 : index
    %c0_0 = arith.constant 0 : index
    %0 = vector.load %arg0[%c0, %c0_0] : memref<2x8xi32, #tpu.memory_space<vmem>>, vector<2x8xi32>
    %c0_1 = arith.constant 0 : index
    %c0_2 = arith.constant 0 : index
    %1 = vector.load %arg1[%c0_1, %c0_2] : memref<2x8xi32, #tpu.memory_space<vmem>>, vector<2x8xi32>
    %c12_i32 = arith.constant 12 : i32
    %2 = vector.broadcast %c12_i32 : i32 to vector<2x8xi32>
    %3 = arith.muli %2, %1 : vector<2x8xi32>
    %4 = arith.addi %0, %3 : vector<2x8xi32>
    %5 = tpu.iota {dimensions = array<i32: 2>} : vector<2x8x25xi32>
    %6 = vector.shape_cast %4 : vector<2x8xi32> to vector<2x8x1xi32>
    %7 = vector.broadcast %6 : vector<2x8x1xi32> to vector<2x8x25xi32>
    %8 = arith.cmpi eq, %5, %7 : vector<2x8x25xi32>
    %9 = arith.extui %8 : vector<2x8x25xi1> to vector<2x8x25xi32>
    %10 = arith.sitofp %9 : vector<2x8x25xi32> to vector<2x8x25xf32>
    %11 = vector.shape_cast %10 : vector<2x8x25xf32> to vector<16x25xf32>
    %c0_3 = arith.constant 0 : index
    %c0_4 = arith.constant 0 : index
    %12 = vector.load %arg2[%c0_3, %c0_4] : memref<25x16xf32, #tpu.memory_space<vmem>>, vector<25x16xf32>
    %cst = arith.constant dense<0.000000e+00> : vector<16x16xf32>
    %13 = tpu.matmul %11, %12, %cst {dimension_numbers = #tpu.dot_dimension_numbers<[1], [0], [0], [1], [0, 0, 1, 1], [], []>} : vector<16x25xf32>, vector<25x16xf32>, vector<16x16xf32> -> vector<16x16xf32>
    %c0_5 = arith.constant 0 : index
    %c0_6 = arith.constant 0 : index
    %14 = vector.load %arg3[%c0_5, %c0_6] : memref<16x128xf32, #tpu.memory_space<vmem>>, vector<16x128xf32>
    %cst_7 = arith.constant dense<0.000000e+00> : vector<16x128xf32>
    %15 = tpu.matmul %13, %14, %cst_7 {dimension_numbers = #tpu.dot_dimension_numbers<[1], [0], [0], [1], [0, 0, 1, 1], [], []>} : vector<16x16xf32>, vector<16x128xf32>, vector<16x128xf32> -> vector<16x128xf32>
    %c0_8 = arith.constant 0 : index
    %c0_9 = arith.constant 0 : index
    %16 = vector.load %arg4[%c0_8, %c0_9] : memref<1x128xf32, #tpu.memory_space<vmem>>, vector<1x128xf32>
    %17 = vector.broadcast %16 : vector<1x128xf32> to vector<16x128xf32>
    %18 = arith.addf %15, %17 : vector<16x128xf32>
    %cst_10 = arith.constant 0.000000e+00 : f32
    %19 = vector.broadcast %cst_10 : f32 to vector<64x128xf32>
    %c0_11 = arith.constant 0 : index
    %c0_12 = arith.constant 0 : index
    %20 = vector.load %arg9[%c0_11, %c0_12] : memref<64x128xf32, #tpu.memory_space<vmem>>, vector<64x128xf32>
    tpu.vector_store %arg9[%c0_11, %c0_12], %19 {strides = array<i32>} : memref<64x128xf32, #tpu.memory_space<vmem>>, vector<64x128xf32>,
    %c0_13 = arith.constant 0 : index
    %c0_14 = arith.constant 0 : index
    %21 = vector.load %arg9[%c0_13, %c0_14] : memref<64x128xf32, #tpu.memory_space<vmem>>, vector<16x128xf32>
    tpu.vector_store %arg9[%c0_13, %c0_14], %18 {strides = array<i32>} : memref<64x128xf32, #tpu.memory_space<vmem>>, vector<16x128xf32>,
    %c0_15 = arith.constant 0 : index
    %c0_16 = arith.constant 0 : index
    %22 = vector.load %arg5[%c0_15, %c0_16] : memref<32x128xbf16, #tpu.memory_space<vmem>>, vector<32x128xbf16>
    %23 = tpu.iota {dimensions = array<i32: 1>} : vector<8x128xi32>
    %c64_i32 = arith.constant 64 : i32
    %24 = vector.broadcast %c64_i32 : i32 to vector<8x128xi32>
    %25 = arith.cmpi sge, %23, %24 : vector<8x128xi32>
    %c96_i32 = arith.constant 96 : i32
    %26 = vector.broadcast %c96_i32 : i32 to vector<8x128xi32>
    %27 = arith.cmpi slt, %23, %26 : vector<8x128xi32>
    %28 = arith.andi %25, %27 : vector<8x128xi1>
    %cst_17 = arith.constant 0.000000e+00 : f32
    %29 = vector.broadcast %cst_17 : f32 to vector<8x32xf32>
    %cst_18 = arith.constant 0.000000e+00 : f32
    %30 = vector.broadcast %cst_18 : f32 to vector<8x32xf32>
    %31 = arith.truncf %29 : vector<8x32xf32> to vector<8x32xbf16>
    %c0_19 = arith.constant 0 : index
    %c0_20 = arith.constant 0 : index
    %32 = tpu.strided_load %arg9[%c0_19, %c0_20] {strides = array<i32: 8, 1>} : memref<64x128xf32, #tpu.memory_space<vmem>>, vector<8x128xf32>
    %cst_21 = arith.constant dense<0.000000e+00> : vector<8x128xf32>
    %33 = tpu.matmul %31, %22, %cst_21 {dimension_numbers = #tpu.dot_dimension_numbers<[1], [0], [0], [1], [0, 0, 1, 1], [], []>} : vector<8x32xbf16>, vector<32x128xbf16>, vector<8x128xf32> -> vector<8x128xf32>
    %34 = arith.addf %32, %33 : vector<8x128xf32>
    %35 = math.tanh %34 : vector<8x128xf32>
    %36 = arith.negf %34 : vector<8x128xf32>
    %37 = math.exp %36 : vector<8x128xf32>
    %cst_22 = arith.constant 1.000000e+00 : f32
    %38 = vector.broadcast %cst_22 : f32 to vector<8x128xf32>
    %39 = arith.addf %38, %37 : vector<8x128xf32>
    %40 = arith.divf %38, %39 : vector<8x128xf32>
    %41 = arith.select %28, %35, %40 : vector<8x128xi1>, vector<8x128xf32>
    %42 = vector.extract_strided_slice %41 {offsets = [0, 0], sizes = [8, 32], strides = [1, 1]} : vector<8x128xf32> to vector<8x32xf32>
    %43 = vector.extract_strided_slice %41 {offsets = [0, 32], sizes = [8, 32], strides = [1, 1]} : vector<8x128xf32> to vector<8x32xf32>
    %44 = vector.extract_strided_slice %41 {offsets = [0, 64], sizes = [8, 32], strides = [1, 1]} : vector<8x128xf32> to vector<8x32xf32>
    %45 = vector.extract_strided_slice %41 {offsets = [0, 96], sizes = [8, 32], strides = [1, 1]} : vector<8x128xf32> to vector<8x32xf32>
    %46 = arith.mulf %43, %30 : vector<8x32xf32>
    %47 = arith.mulf %42, %44 : vector<8x32xf32>
    %48 = arith.addf %46, %47 : vector<8x32xf32>
    %49 = math.tanh %48 : vector<8x32xf32>
    %50 = arith.mulf %45, %49 : vector<8x32xf32>
    %51 = arith.truncf %50 : vector<8x32xf32> to vector<8x32xbf16>
    %c0_23 = arith.constant 0 : index
    %c0_24 = arith.constant 0 : index
    %52 = vector.load %arg10[%c0_23, %c0_24] : memref<64x32xf32, #tpu.memory_space<vmem>>, vector<8x32xf32>
    tpu.vector_store %arg10[%c0_23, %c0_24], %50 {strides = array<i32>} : memref<64x32xf32, #tpu.memory_space<vmem>>, vector<8x32xf32>,
    %c1 = arith.constant 1 : index
    %c0_25 = arith.constant 0 : index
    %53 = tpu.strided_load %arg9[%c1, %c0_25] {strides = array<i32: 8, 1>} : memref<64x128xf32, #tpu.memory_space<vmem>>, vector<8x128xf32>
    %cst_26 = arith.constant dense<0.000000e+00> : vector<8x128xf32>
    %54 = tpu.matmul %51, %22, %cst_26 {dimension_numbers = #tpu.dot_dimension_numbers<[1], [0], [0], [1], [0, 0, 1, 1], [], []>} : vector<8x32xbf16>, vector<32x128xbf16>, vector<8x128xf32> -> vector<8x128xf32>
    %55 = arith.addf %53, %54 : vector<8x128xf32>
    %56 = math.tanh %55 : vector<8x128xf32>
    %57 = arith.negf %55 : vector<8x128xf32>
    %58 = math.exp %57 : vector<8x128xf32>
    %cst_27 = arith.constant 1.000000e+00 : f32
    %59 = vector.broadcast %cst_27 : f32 to vector<8x128xf32>
    %60 = arith.addf %59, %58 : vector<8x128xf32>
    %61 = arith.divf %59, %60 : vector<8x128xf32>
    %62 = arith.select %28, %56, %61 : vector<8x128xi1>, vector<8x128xf32>
    %63 = vector.extract_strided_slice %62 {offsets = [0, 0], sizes = [8, 32], strides = [1, 1]} : vector<8x128xf32> to vector<8x32xf32>
    %64 = vector.extract_strided_slice %62 {offsets = [0, 32], sizes = [8, 32], strides = [1, 1]} : vector<8x128xf32> to vector<8x32xf32>
    %65 = vector.extract_strided_slice %62 {offsets = [0, 64], sizes = [8, 32], strides = [1, 1]} : vector<8x128xf32> to vector<8x32xf32>
    %66 = vector.extract_strided_slice %62 {offsets = [0, 96], sizes = [8, 32], strides = [1, 1]} : vector<8x128xf32> to vector<8x32xf32>
    %67 = arith.mulf %64, %48 : vector<8x32xf32>
    %68 = arith.mulf %63, %65 : vector<8x32xf32>
    %69 = arith.addf %67, %68 : vector<8x32xf32>
    %70 = math.tanh %69 : vector<8x32xf32>
    %71 = arith.mulf %66, %70 : vector<8x32xf32>
    %72 = arith.truncf %71 : vector<8x32xf32> to vector<8x32xbf16>
    %c8 = arith.constant 8 : index
    %c0_28 = arith.constant 0 : index
    %73 = vector.load %arg10[%c8, %c0_28] : memref<64x32xf32, #tpu.memory_space<vmem>>, vector<8x32xf32>
    tpu.vector_store %arg10[%c8, %c0_28], %71 {strides = array<i32>} : memref<64x32xf32, #tpu.memory_space<vmem>>, vector<8x32xf32>,
    %c2 = arith.constant 2 : index
    %c0_29 = arith.constant 0 : index
    %74 = tpu.strided_load %arg9[%c2, %c0_29] {strides = array<i32: 8, 1>} : memref<64x128xf32, #tpu.memory_space<vmem>>, vector<8x128xf32>
    %cst_30 = arith.constant dense<0.000000e+00> : vector<8x128xf32>
    %75 = tpu.matmul %72, %22, %cst_30 {dimension_numbers = #tpu.dot_dimension_numbers<[1], [0], [0], [1], [0, 0, 1, 1], [], []>} : vector<8x32xbf16>, vector<32x128xbf16>, vector<8x128xf32> -> vector<8x128xf32>
    %76 = arith.addf %74, %75 : vector<8x128xf32>
    %77 = math.tanh %76 : vector<8x128xf32>
    %78 = arith.negf %76 : vector<8x128xf32>
    %79 = math.exp %78 : vector<8x128xf32>
    %cst_31 = arith.constant 1.000000e+00 : f32
    %80 = vector.broadcast %cst_31 : f32 to vector<8x128xf32>
    %81 = arith.addf %80, %79 : vector<8x128xf32>
    %82 = arith.divf %80, %81 : vector<8x128xf32>
    %83 = arith.select %28, %77, %82 : vector<8x128xi1>, vector<8x128xf32>
    %84 = vector.extract_strided_slice %83 {offsets = [0, 0], sizes = [8, 32], strides = [1, 1]} : vector<8x128xf32> to vector<8x32xf32>
    %85 = vector.extract_strided_slice %83 {offsets = [0, 32], sizes = [8, 32], strides = [1, 1]} : vector<8x128xf32> to vector<8x32xf32>
    %86 = vector.extract_strided_slice %83 {offsets = [0, 64], sizes = [8, 32], strides = [1, 1]} : vector<8x128xf32> to vector<8x32xf32>
    %87 = vector.extract_strided_slice %83 {offsets = [0, 96], sizes = [8, 32], strides = [1, 1]} : vector<8x128xf32> to vector<8x32xf32>
    %88 = arith.mulf %85, %69 : vector<8x32xf32>
    %89 = arith.mulf %84, %86 : vector<8x32xf32>
    %90 = arith.addf %88, %89 : vector<8x32xf32>
    %91 = math.tanh %90 : vector<8x32xf32>
    %92 = arith.mulf %87, %91 : vector<8x32xf32>
    %93 = arith.truncf %92 : vector<8x32xf32> to vector<8x32xbf16>
    %c16 = arith.constant 16 : index
    %c0_32 = arith.constant 0 : index
    %94 = vector.load %arg10[%c16, %c0_32] : memref<64x32xf32, #tpu.memory_space<vmem>>, vector<8x32xf32>
    tpu.vector_store %arg10[%c16, %c0_32], %92 {strides = array<i32>} : memref<64x32xf32, #tpu.memory_space<vmem>>, vector<8x32xf32>,
    %c3 = arith.constant 3 : index
    %c0_33 = arith.constant 0 : index
    %95 = tpu.strided_load %arg9[%c3, %c0_33] {strides = array<i32: 8, 1>} : memref<64x128xf32, #tpu.memory_space<vmem>>, vector<8x128xf32>
    %cst_34 = arith.constant dense<0.000000e+00> : vector<8x128xf32>
    %96 = tpu.matmul %93, %22, %cst_34 {dimension_numbers = #tpu.dot_dimension_numbers<[1], [0], [0], [1], [0, 0, 1, 1], [], []>} : vector<8x32xbf16>, vector<32x128xbf16>, vector<8x128xf32> -> vector<8x128xf32>
    %97 = arith.addf %95, %96 : vector<8x128xf32>
    %98 = math.tanh %97 : vector<8x128xf32>
    %99 = arith.negf %97 : vector<8x128xf32>
    %100 = math.exp %99 : vector<8x128xf32>
    %cst_35 = arith.constant 1.000000e+00 : f32
    %101 = vector.broadcast %cst_35 : f32 to vector<8x128xf32>
    %102 = arith.addf %101, %100 : vector<8x128xf32>
    %103 = arith.divf %101, %102 : vector<8x128xf32>
    %104 = arith.select %28, %98, %103 : vector<8x128xi1>, vector<8x128xf32>
    %105 = vector.extract_strided_slice %104 {offsets = [0, 0], sizes = [8, 32], strides = [1, 1]} : vector<8x128xf32> to vector<8x32xf32>
    %106 = vector.extract_strided_slice %104 {offsets = [0, 32], sizes = [8, 32], strides = [1, 1]} : vector<8x128xf32> to vector<8x32xf32>
    %107 = vector.extract_strided_slice %104 {offsets = [0, 64], sizes = [8, 32], strides = [1, 1]} : vector<8x128xf32> to vector<8x32xf32>
    %108 = vector.extract_strided_slice %104 {offsets = [0, 96], sizes = [8, 32], strides = [1, 1]} : vector<8x128xf32> to vector<8x32xf32>
    %109 = arith.mulf %106, %90 : vector<8x32xf32>
    %110 = arith.mulf %105, %107 : vector<8x32xf32>
    %111 = arith.addf %109, %110 : vector<8x32xf32>
    %112 = math.tanh %111 : vector<8x32xf32>
    %113 = arith.mulf %108, %112 : vector<8x32xf32>
    %114 = arith.truncf %113 : vector<8x32xf32> to vector<8x32xbf16>
    %c24 = arith.constant 24 : index
    %c0_36 = arith.constant 0 : index
    %115 = vector.load %arg10[%c24, %c0_36] : memref<64x32xf32, #tpu.memory_space<vmem>>, vector<8x32xf32>
    tpu.vector_store %arg10[%c24, %c0_36], %113 {strides = array<i32>} : memref<64x32xf32, #tpu.memory_space<vmem>>, vector<8x32xf32>,
    %c4 = arith.constant 4 : index
    %c0_37 = arith.constant 0 : index
    %116 = tpu.strided_load %arg9[%c4, %c0_37] {strides = array<i32: 8, 1>} : memref<64x128xf32, #tpu.memory_space<vmem>>, vector<8x128xf32>
    %cst_38 = arith.constant dense<0.000000e+00> : vector<8x128xf32>
    %117 = tpu.matmul %114, %22, %cst_38 {dimension_numbers = #tpu.dot_dimension_numbers<[1], [0], [0], [1], [0, 0, 1, 1], [], []>} : vector<8x32xbf16>, vector<32x128xbf16>, vector<8x128xf32> -> vector<8x128xf32>
    %118 = arith.addf %116, %117 : vector<8x128xf32>
    %119 = math.tanh %118 : vector<8x128xf32>
    %120 = arith.negf %118 : vector<8x128xf32>
    %121 = math.exp %120 : vector<8x128xf32>
    %cst_39 = arith.constant 1.000000e+00 : f32
    %122 = vector.broadcast %cst_39 : f32 to vector<8x128xf32>
    %123 = arith.addf %122, %121 : vector<8x128xf32>
    %124 = arith.divf %122, %123 : vector<8x128xf32>
    %125 = arith.select %28, %119, %124 : vector<8x128xi1>, vector<8x128xf32>
    %126 = vector.extract_strided_slice %125 {offsets = [0, 0], sizes = [8, 32], strides = [1, 1]} : vector<8x128xf32> to vector<8x32xf32>
    %127 = vector.extract_strided_slice %125 {offsets = [0, 32], sizes = [8, 32], strides = [1, 1]} : vector<8x128xf32> to vector<8x32xf32>
    %128 = vector.extract_strided_slice %125 {offsets = [0, 64], sizes = [8, 32], strides = [1, 1]} : vector<8x128xf32> to vector<8x32xf32>
    %129 = vector.extract_strided_slice %125 {offsets = [0, 96], sizes = [8, 32], strides = [1, 1]} : vector<8x128xf32> to vector<8x32xf32>
    %130 = arith.mulf %127, %111 : vector<8x32xf32>
    %131 = arith.mulf %126, %128 : vector<8x32xf32>
    %132 = arith.addf %130, %131 : vector<8x32xf32>
    %133 = math.tanh %132 : vector<8x32xf32>
    %134 = arith.mulf %129, %133 : vector<8x32xf32>
    %135 = arith.truncf %134 : vector<8x32xf32> to vector<8x32xbf16>
    %c32 = arith.constant 32 : index
    %c0_40 = arith.constant 0 : index
    %136 = vector.load %arg10[%c32, %c0_40] : memref<64x32xf32, #tpu.memory_space<vmem>>, vector<8x32xf32>
    tpu.vector_store %arg10[%c32, %c0_40], %134 {strides = array<i32>} : memref<64x32xf32, #tpu.memory_space<vmem>>, vector<8x32xf32>,
    %c5 = arith.constant 5 : index
    %c0_41 = arith.constant 0 : index
    %137 = tpu.strided_load %arg9[%c5, %c0_41] {strides = array<i32: 8, 1>} : memref<64x128xf32, #tpu.memory_space<vmem>>, vector<8x128xf32>
    %cst_42 = arith.constant dense<0.000000e+00> : vector<8x128xf32>
    %138 = tpu.matmul %135, %22, %cst_42 {dimension_numbers = #tpu.dot_dimension_numbers<[1], [0], [0], [1], [0, 0, 1, 1], [], []>} : vector<8x32xbf16>, vector<32x128xbf16>, vector<8x128xf32> -> vector<8x128xf32>
    %139 = arith.addf %137, %138 : vector<8x128xf32>
    %140 = math.tanh %139 : vector<8x128xf32>
    %141 = arith.negf %139 : vector<8x128xf32>
    %142 = math.exp %141 : vector<8x128xf32>
    %cst_43 = arith.constant 1.000000e+00 : f32
    %143 = vector.broadcast %cst_43 : f32 to vector<8x128xf32>
    %144 = arith.addf %143, %142 : vector<8x128xf32>
    %145 = arith.divf %143, %144 : vector<8x128xf32>
    %146 = arith.select %28, %140, %145 : vector<8x128xi1>, vector<8x128xf32>
    %147 = vector.extract_strided_slice %146 {offsets = [0, 0], sizes = [8, 32], strides = [1, 1]} : vector<8x128xf32> to vector<8x32xf32>
    %148 = vector.extract_strided_slice %146 {offsets = [0, 32], sizes = [8, 32], strides = [1, 1]} : vector<8x128xf32> to vector<8x32xf32>
    %149 = vector.extract_strided_slice %146 {offsets = [0, 64], sizes = [8, 32], strides = [1, 1]} : vector<8x128xf32> to vector<8x32xf32>
    %150 = vector.extract_strided_slice %146 {offsets = [0, 96], sizes = [8, 32], strides = [1, 1]} : vector<8x128xf32> to vector<8x32xf32>
    %151 = arith.mulf %148, %132 : vector<8x32xf32>
    %152 = arith.mulf %147, %149 : vector<8x32xf32>
    %153 = arith.addf %151, %152 : vector<8x32xf32>
    %154 = math.tanh %153 : vector<8x32xf32>
    %155 = arith.mulf %150, %154 : vector<8x32xf32>
    %156 = arith.truncf %155 : vector<8x32xf32> to vector<8x32xbf16>
    %c40 = arith.constant 40 : index
    %c0_44 = arith.constant 0 : index
    %157 = vector.load %arg10[%c40, %c0_44] : memref<64x32xf32, #tpu.memory_space<vmem>>, vector<8x32xf32>
    tpu.vector_store %arg10[%c40, %c0_44], %155 {strides = array<i32>} : memref<64x32xf32, #tpu.memory_space<vmem>>, vector<8x32xf32>,
    %c6 = arith.constant 6 : index
    %c0_45 = arith.constant 0 : index
    %158 = tpu.strided_load %arg9[%c6, %c0_45] {strides = array<i32: 8, 1>} : memref<64x128xf32, #tpu.memory_space<vmem>>, vector<8x128xf32>
    %cst_46 = arith.constant dense<0.000000e+00> : vector<8x128xf32>
    %159 = tpu.matmul %156, %22, %cst_46 {dimension_numbers = #tpu.dot_dimension_numbers<[1], [0], [0], [1], [0, 0, 1, 1], [], []>} : vector<8x32xbf16>, vector<32x128xbf16>, vector<8x128xf32> -> vector<8x128xf32>
    %160 = arith.addf %158, %159 : vector<8x128xf32>
    %161 = math.tanh %160 : vector<8x128xf32>
    %162 = arith.negf %160 : vector<8x128xf32>
    %163 = math.exp %162 : vector<8x128xf32>
    %cst_47 = arith.constant 1.000000e+00 : f32
    %164 = vector.broadcast %cst_47 : f32 to vector<8x128xf32>
    %165 = arith.addf %164, %163 : vector<8x128xf32>
    %166 = arith.divf %164, %165 : vector<8x128xf32>
    %167 = arith.select %28, %161, %166 : vector<8x128xi1>, vector<8x128xf32>
    %168 = vector.extract_strided_slice %167 {offsets = [0, 0], sizes = [8, 32], strides = [1, 1]} : vector<8x128xf32> to vector<8x32xf32>
    %169 = vector.extract_strided_slice %167 {offsets = [0, 32], sizes = [8, 32], strides = [1, 1]} : vector<8x128xf32> to vector<8x32xf32>
    %170 = vector.extract_strided_slice %167 {offsets = [0, 64], sizes = [8, 32], strides = [1, 1]} : vector<8x128xf32> to vector<8x32xf32>
    %171 = vector.extract_strided_slice %167 {offsets = [0, 96], sizes = [8, 32], strides = [1, 1]} : vector<8x128xf32> to vector<8x32xf32>
    %172 = arith.mulf %169, %153 : vector<8x32xf32>
    %173 = arith.mulf %168, %170 : vector<8x32xf32>
    %174 = arith.addf %172, %173 : vector<8x32xf32>
    %175 = math.tanh %174 : vector<8x32xf32>
    %176 = arith.mulf %171, %175 : vector<8x32xf32>
    %177 = arith.truncf %176 : vector<8x32xf32> to vector<8x32xbf16>
    %c48 = arith.constant 48 : index
    %c0_48 = arith.constant 0 : index
    %178 = vector.load %arg10[%c48, %c0_48] : memref<64x32xf32, #tpu.memory_space<vmem>>, vector<8x32xf32>
    tpu.vector_store %arg10[%c48, %c0_48], %176 {strides = array<i32>} : memref<64x32xf32, #tpu.memory_space<vmem>>, vector<8x32xf32>,
    %c7 = arith.constant 7 : index
    %c0_49 = arith.constant 0 : index
    %179 = tpu.strided_load %arg9[%c7, %c0_49] {strides = array<i32: 8, 1>} : memref<64x128xf32, #tpu.memory_space<vmem>>, vector<8x128xf32>
    %cst_50 = arith.constant dense<0.000000e+00> : vector<8x128xf32>
    %180 = tpu.matmul %177, %22, %cst_50 {dimension_numbers = #tpu.dot_dimension_numbers<[1], [0], [0], [1], [0, 0, 1, 1], [], []>} : vector<8x32xbf16>, vector<32x128xbf16>, vector<8x128xf32> -> vector<8x128xf32>
    %181 = arith.addf %179, %180 : vector<8x128xf32>
    %182 = math.tanh %181 : vector<8x128xf32>
    %183 = arith.negf %181 : vector<8x128xf32>
    %184 = math.exp %183 : vector<8x128xf32>
    %cst_51 = arith.constant 1.000000e+00 : f32
    %185 = vector.broadcast %cst_51 : f32 to vector<8x128xf32>
    %186 = arith.addf %185, %184 : vector<8x128xf32>
    %187 = arith.divf %185, %186 : vector<8x128xf32>
    %188 = arith.select %28, %182, %187 : vector<8x128xi1>, vector<8x128xf32>
    %189 = vector.extract_strided_slice %188 {offsets = [0, 0], sizes = [8, 32], strides = [1, 1]} : vector<8x128xf32> to vector<8x32xf32>
    %190 = vector.extract_strided_slice %188 {offsets = [0, 32], sizes = [8, 32], strides = [1, 1]} : vector<8x128xf32> to vector<8x32xf32>
    %191 = vector.extract_strided_slice %188 {offsets = [0, 64], sizes = [8, 32], strides = [1, 1]} : vector<8x128xf32> to vector<8x32xf32>
    %192 = vector.extract_strided_slice %188 {offsets = [0, 96], sizes = [8, 32], strides = [1, 1]} : vector<8x128xf32> to vector<8x32xf32>
    %193 = arith.mulf %190, %174 : vector<8x32xf32>
    %194 = arith.mulf %189, %191 : vector<8x32xf32>
    %195 = arith.addf %193, %194 : vector<8x32xf32>
    %196 = math.tanh %195 : vector<8x32xf32>
    %197 = arith.mulf %192, %196 : vector<8x32xf32>
    %c56 = arith.constant 56 : index
    %c0_52 = arith.constant 0 : index
    %198 = vector.load %arg10[%c56, %c0_52] : memref<64x32xf32, #tpu.memory_space<vmem>>, vector<8x32xf32>
    tpu.vector_store %arg10[%c56, %c0_52], %197 {strides = array<i32>} : memref<64x32xf32, #tpu.memory_space<vmem>>, vector<8x32xf32>,
    %c0_53 = arith.constant 0 : index
    %c0_54 = arith.constant 0 : index
    %199 = vector.load %arg6[%c0_53, %c0_54] : memref<32x12xf32, #tpu.memory_space<vmem>>, vector<32x12xf32>
    %c0_55 = arith.constant 0 : index
    %c0_56 = arith.constant 0 : index
    %200 = vector.load %arg7[%c0_55, %c0_56] : memref<1x12xf32, #tpu.memory_space<vmem>>, vector<1x12xf32>
    %c0_57 = arith.constant 0 : index
    %c0_58 = arith.constant 0 : index
    %201 = tpu.strided_load %arg10[%c0_57, %c0_58] {strides = array<i32: 8, 1>} : memref<64x32xf32, #tpu.memory_space<vmem>>, vector<8x32xf32>
    %cst_59 = arith.constant dense<0.000000e+00> : vector<8x12xf32>
    %202 = tpu.matmul %201, %199, %cst_59 {dimension_numbers = #tpu.dot_dimension_numbers<[1], [0], [0], [1], [0, 0, 1, 1], [], []>} : vector<8x32xf32>, vector<32x12xf32>, vector<8x12xf32> -> vector<8x12xf32>
    %203 = vector.broadcast %200 : vector<1x12xf32> to vector<8x12xf32>
    %204 = arith.addf %202, %203 : vector<8x12xf32>
    %205 = arith.negf %204 : vector<8x12xf32>
    %206 = math.exp %205 : vector<8x12xf32>
    %cst_60 = arith.constant 1.000000e+00 : f32
    %207 = vector.broadcast %cst_60 : f32 to vector<8x12xf32>
    %208 = arith.addf %207, %206 : vector<8x12xf32>
    %209 = arith.divf %207, %208 : vector<8x12xf32>
    %c0_61 = arith.constant 0 : index
    %c0_62 = arith.constant 0 : index
    %c0_63 = arith.constant 0 : index
    %210 = vector.load %arg8[%c0_61, %c0_62, %c0_63] : memref<2x8x12xf32, #tpu.memory_space<vmem>>, vector<1x8x12xf32>
    %211 = vector.shape_cast %210 : vector<1x8x12xf32> to vector<8x12xf32>
    %212 = vector.shape_cast %209 : vector<8x12xf32> to vector<1x8x12xf32>
    tpu.vector_store %arg8[%c0_61, %c0_62, %c0_63], %212 {strides = array<i32>} : memref<2x8x12xf32, #tpu.memory_space<vmem>>, vector<1x8x12xf32>,
    %c1_64 = arith.constant 1 : index
    %c0_65 = arith.constant 0 : index
    %213 = tpu.strided_load %arg10[%c1_64, %c0_65] {strides = array<i32: 8, 1>} : memref<64x32xf32, #tpu.memory_space<vmem>>, vector<8x32xf32>
    %cst_66 = arith.constant dense<0.000000e+00> : vector<8x12xf32>
    %214 = tpu.matmul %213, %199, %cst_66 {dimension_numbers = #tpu.dot_dimension_numbers<[1], [0], [0], [1], [0, 0, 1, 1], [], []>} : vector<8x32xf32>, vector<32x12xf32>, vector<8x12xf32> -> vector<8x12xf32>
    %215 = vector.broadcast %200 : vector<1x12xf32> to vector<8x12xf32>
    %216 = arith.addf %214, %215 : vector<8x12xf32>
    %217 = arith.negf %216 : vector<8x12xf32>
    %218 = math.exp %217 : vector<8x12xf32>
    %cst_67 = arith.constant 1.000000e+00 : f32
    %219 = vector.broadcast %cst_67 : f32 to vector<8x12xf32>
    %220 = arith.addf %219, %218 : vector<8x12xf32>
    %221 = arith.divf %219, %220 : vector<8x12xf32>
    %c1_68 = arith.constant 1 : index
    %c0_69 = arith.constant 0 : index
    %c0_70 = arith.constant 0 : index
    %222 = vector.load %arg8[%c1_68, %c0_69, %c0_70] : memref<2x8x12xf32, #tpu.memory_space<vmem>>, vector<1x8x12xf32>
    %223 = vector.shape_cast %222 : vector<1x8x12xf32> to vector<8x12xf32>
    %224 = vector.shape_cast %221 : vector<8x12xf32> to vector<1x8x12xf32>
    tpu.vector_store %arg8[%c1_68, %c0_69, %c0_70], %224 {strides = array<i32>} : memref<2x8x12xf32, #tpu.memory_space<vmem>>, vector<1x8x12xf32>,
    return
  }
}

</mosaic_0001>

<bundles_post_ra>
// kernel: dkt_forward.1
= control target key start
LH: loop header
LB: loop body
LE: loop exit
PB: predicated region body
PF: predicated region fallthrough
CT: control target
= control target key end

     0   :  { %v35_v2 = vlaneseq  ;;  %vm68_vm0 = vcmask 1040384   ;;  %v1397_v8 = vmov 0.0   ;;  %s1685_s0 = inlined_call_operand.vmem [shape: s32[2,8], index: 0, kind: input, shape index: {}]   ;;  %s1686_s1 = inlined_call_operand.vmem [shape: s32[2,8], index: 1, kind: input, shape index: {}]   ;;  %s1687_s2 = inlined_call_operand.vmem [shape: f32[25,16], index: 2, kind: input, shape index: {}]   ;;  %s1688_s3 = inlined_call_operand.vmem [shape: f32[16,128], index: 3, kind: input, shape index: {}]   ;;  %s1689_s4 = inlined_call_operand.vmem [shape: f32[1,128], index: 4, kind: input, shape index: {}]   ;;  %s1690_s5 = inlined_call_operand.vmem [shape: bf16[32,128], index: 5, kind: input, shape index: {}]   ;;  %s1691_s6 = inlined_call_operand.vmem [shape: f32[32,12], index: 6, kind: input, shape index: {}]   ;;  %s1692_s7 = inlined_call_operand.vmem [shape: f32[1,12], index: 7, kind: input, shape index: {}]   ;;  %s1693_s8 = inlined_call_operand.hbm [shape: f32[2,8,12], index: 8, kind: output, shape index: {}]  }
   0x1   :  { %v31_v0 = vld [vmem:[%s1685_s0] sm:$0x3]  ;;  %v60_v3 = vld [vmem:[%s1687_s2 + $0x18] sm:$0x1]  ;;  %v59_v5 = vld [vmem:[%s1687_s2 + $0x10] sm:$0xff]  ;;  %240 = vst [vmem:[#allocation2 + $0x10] sm:$0xff] %v1397_v8 }
   0x2   :  { %v32_v1 = vld [vmem:[%s1686_s1] sm:$0x3]  ;;  %v38_v6 = vshrl.u32 %v35_v2, 7  ;;  %1189 = vmatprep.subr.msk.mxu0 %vm68_vm0, %v60_v3  ;;  %v58_v7 = vld [vmem:[%s1687_s2 + $0x8] sm:$0xff]  ;;  %241 = vst [vmem:[#allocation2 + $0x18] sm:$0xff] %v1397_v8  ;;  %242 = vst [vmem:[#allocation2 + $0x20] sm:$0xff] %v1397_v8 }
   0x3   :  { %v33_v4 = vmul.u32 12, %v32_v1  ;;  %243 = vst [vmem:[#allocation2 + $0x28] sm:$0xff] %v1397_v8  ;;  %244 = vst [vmem:[#allocation2 + $0x30] sm:$0xff] %v1397_v8  ;;  %1190 = vmatpush3.msk.msra.mxu0 %vm68_vm0, %v60_v3 }
   0x4   :  { %245 = vst [vmem:[#allocation2 + $0x38] sm:$0xff] %v1397_v8  ;;  %v39_v10 = vsub.s32 0, %v38_v6  ;;  %v46_v11 = vsub.s32 1, %v38_v6  ;;  %1191 = vmatprep.subr.mxu0 %v59_v5 }
   0x5   :  { %v34_v9 = vadd.s32 %v33_v4, %v31_v0 }
   0x6   :  { %13 = vsyncpa [#allocation5], 0  ;;  %1192 = vmatpush3.msra.mxu0 %v59_v5  ;;  %v57_v12 = vld [vmem:[%s1687_s2] sm:$0xff]  ;;  %v1475_v15 = vand.u32 127, %v35_v2  ;;  %vm61_vm1 = vcmask 203776   ;;  %v148_v20 = vld [vmem:[%s1688_s3 + $0x8] sm:$0xff] }
   0x7   :  { %v40_v13 = vrot.slane %v34_v9, %v39_v10  ;;  %1193 = vmatprep.subr.mxu0 %v58_v7  ;;  %v47_v14 = vrot.slane %v34_v9, %v46_v11  ;;  %1200 = vmatprep.subr.mxu1 %v148_v20  ;;  %v147_v21 = vld [vmem:[%s1688_s3] sm:$0xff]  ;;  %v1490_v22 = vld [vmem:[%s1690_s5 + $0x8] sm:$0xff]   ;;  %vm1398_vm4 = vmmov 0   ;;  %vm156_vm5 = vcmask 130048   ;;  %s1401_s22 = smov 32   ;;  %s1402_s10 = smov [#allocation4]  }
   0x8   :  { %1194 = vmatpush3.msra.mxu0 %v58_v7  ;;  %1201 = vmatpush3.msra.mxu1 %v148_v20  ;;  %v1498_v23 = vld [vmem:[%s1690_s5] sm:$0xff]   ;;  %v1399_v26 = vmov 0   ;;  %vm252_vm6 = vcmp.ge.s32.totalorder %v1475_v15, 64  ;;  %vm253_vm7 = vcmp.lt.s32.totalorder %v1475_v15, 96  ;;  %vm270_vm9 = vcmask 261120   ;;  %s1104_s11 = sshll.u32 %s1402_s10, 4  ;;  %s1105_s11 = int_to_ptr.vmem [resolvable:$true] %s1104_s11 }
   0x9   :  { %42 = vbcast.lane.b32.xlu0 %v40_v13, 256  ;;  %1195 = vmatprep.subr.mxu0 %v57_v12  ;;  %v1120_v27 = vld [vmem:[%s1689_s4] ss:$0 sm:$0xff]  ;;  %vm1521_vm8 = vmand %vm252_vm6, %vm253_vm7  ;;  %s1400_s4 = smov 64   ;;  %vm1012_vm10 = vcmask 97280   ;;  %p1380_p1 = scmp.lt.s32.totalorder %s1105_s11, %s1105_s11 }
   0xa   :  { %1196 = vmatpush3.msra.mxu0 %v57_v12  ;;  %1202 = vmatprep.subr.mxu1 %v147_v21 }
   0xb   :  { %1215 = vmatprep.subr.bf16.mxu0 %v1397_v8  ;;  %1203 = vmatpush3.msra.mxu1 %v147_v21  ;;  %v256_v33 = vld [vmem:[#allocation2] ss:$8 sm:$0xf0]  ;;  %v348_v58 = vld [vmem:[#allocation2 + $0x1] ss:$8 sm:$0xf0] }
   0xc   :  { %1207 = vmatprep.subr.bf16.mxu1 %v1397_v8 }
   0xd   :  { %49 = vbcast.lane.b32.xlu0 %v47_v14, 256 }
  0x7b   :  { %v43_v16 = vpop.permute.xlu0 %42 }
  0x7c   :  { %vm51_vm2 = vcmp.eq.s32.totalorder %v1475_v15, %v43_v16 }
  0x7d   :  { %v1115_v17 = vsel %vm51_vm2, 1.0, %v1397_v8 }
  0x7e   :  { %1197 = vmatprep.mubr.msk.f32.mxu0 %vm61_vm1, %v1115_v17 }
  0x7f   :  { %v50_v18 = vpop.permute.xlu0 %49 }
  0x80   :  { %vm52_vm3 = vcmp.eq.s32.totalorder %v1475_v15, %v50_v18 }
  0x81   :  { %v1116_v19 = vsel %vm52_vm3, 1.0, %v1397_v8 }
  0x82   :  { %1198 = vmatmul.mubr.msk.f32.vlgmr.msra.gmra.mxu0 %vm61_vm1, %v1116_v19  ;;  %v430_v19 = vld [vmem:[#allocation2 + $0x2] ss:$8 sm:$0xf0] }
  0x83   :  { %1216 = vmatpush3.bf16.msra.mxu0 %v1490_v22  ;;  %1219 = vmatprep.mubr.msk.bf16.mxu0 %vm1398_vm4, %v1397_v8 }
  0x84   :  { %1217 = vmatprep.subr.bf16.mxu0 %v1397_v8 }
  0x87   :  { %1218 = vmatpush3.bf16.msra.mxu0 %v1498_v23 }
  0x88   :  { %1231 = vmatprep.subr.bf16.mxu0 %v1397_v8 }
 0x142   :  { %v1199_v24 = vpop.f32.mrf.mxu0 }
 0x144   :  { %v138_v25 = vpop.f32.mrf.mxu0 }
 0x145   :  { %1204 = vmatprep.mubr.msk.f32.mxu1 %vm156_vm5, %v138_v25 }
 0x146   :  { %1205 = vmatmul.mubr.msk.f32.vlgmr.msra.gmra.mxu1 %vm156_vm5, %v1199_v24 }
 0x147   :  { %1208 = vmatpush3.bf16.msra.mxu1 %v1490_v22  ;;  %1211 = vmatprep.mubr.msk.bf16.mxu1 %vm1398_vm4, %v1397_v8 }
 0x148   :  { %1209 = vmatprep.subr.bf16.mxu1 %v1397_v8 }
 0x14b   :  { %1210 = vmatpush3.bf16.msra.mxu1 %v1498_v23 }
 0x14c   :  { %1223 = vmatprep.subr.bf16.mxu1 %v1397_v8 }
 0x14e   :  { %1212 = vmatmul.mubr.bf16.vlgmr.msra.gmra.mxu1 %v1399_v26 }
 0x14f   :  { %1224 = vmatpush3.bf16.msra.mxu1 %v1490_v22  ;;  %1227 = vmatprep.mubr.msk.bf16.mxu1 %vm1398_vm4, %v1397_v8 }
 0x150   :  { %1225 = vmatprep.subr.bf16.mxu1 %v1397_v8 }
 0x153   :  { %1226 = vmatpush3.bf16.msra.mxu1 %v1498_v23 }
 0x154   :  { %1239 = vmatprep.subr.bf16.mxu1 %v1397_v8 }
 0x206   :  { %v1206_v28 = vpop.f32.mrf.mxu1 }
 0x207   :  { %v235_v29 = vadd.f32 %v1206_v28, %v1120_v27 }
 0x208   :  { %v229_v30 = vpop.f32.mrf.mxu1 }
 0x209   :  { %247 = vst [vmem:[#allocation2 + $0x8] sm:$0xff] %v235_v29  ;;  %v230_v31 = vadd.f32 %v1120_v27, %v229_v30 }
 0x20b   :  { %246 = vst [vmem:[#allocation2] sm:$0xff] %v230_v31 }
 0x20e   :  { %v308_v32 = vpop.f32.mrf.mxu1 }
 0x210   :  { %v1213_v34 = vpop.f32.mrf.mxu1 }
 0x212   :  { %v255_v35 = vld [vmem:[#allocation2] ss:$8 sm:$0xf]  ;;  %v311_v36 = vpop.f32.mrf.mxu1  ;;  %v347_v57 = vld [vmem:[#allocation2 + $0x1] ss:$8 sm:$0xf] }
 0x213   :  { %v257_v37 = vor.u32 %v256_v33, %v255_v35  ;;  %v349_v59 = vor.u32 %v348_v58, %v347_v57  ;;  %v429_v18 = vld [vmem:[#allocation2 + $0x2] ss:$8 sm:$0xf] }
 0x214   :  { %v1214_v38 = vpop.f32.mrf.mxu1  ;;  %v431_v20 = vor.u32 %v430_v19, %v429_v18 }
 0x215   :  { %v314_v39 = vadd.f32 %v308_v32, %v257_v37 }
 0x217   :  { %v1125_v40 = vmul.f32 -1.442695, %v314_v39 }
 0x219   :  { %1303 = vpow2.f32 %v1125_v40 }
 0x21a   :  { %1305 = vtanh.f32 %v314_v39 }
 0x226   :  { %v1304_v41 = vpop.eup %1303 }
 0x227   :  { %v319_v42 = vadd.f32 1.0, %v1304_v41  ;;  %v1306_v44 = vpop.eup %1305 }
 0x229   :  { %1307 = vrcp.f32 %v319_v42 }
 0x236   :  { %v1308_v45 = vpop.eup %1307 }
 0x237   :  { %v322_v46 = vsel %vm1521_vm8, %v1306_v44, %v1308_v45  ;;  %v511_v45 = vld [vmem:[#allocation2 + $0x3] ss:$8 sm:$0xf] }
 0x238   :  { %325 = vrot.lane.b32.xlu1 %v322_v46, %s1400_s4  ;;  %v323_v49 = vmul.f32 0.0, %v322_v46 }
 0x2aa   :  { %v326_v47 = vpop.permute.xlu1 %325 }
 0x2ab   :  { %v328_v48 = vmul.f32 %v326_v47, %v322_v46 }
 0x2ad   :  { %330 = vrot.lane.b32.xlu1 %v328_v48, %s1401_s22 }
 0x31f   :  { %v331_v50 = vpop.permute.xlu1 %330 }
 0x320   :  { %v333_v51 = vadd.f32 %v331_v50, %v323_v49 }
 0x322   :  { %1309 = vtanh.f32 %v333_v51 }
 0x32f   :  { %v1310_v52 = vpop.eup %1309 }
 0x330   :  { %336 = vrot.lane.b32.xlu0 %v1310_v52, %s1400_s4 }
 0x3a2   :  { %v337_v53 = vpop.permute.xlu0 %336 }
 0x3a3   :  { %v1530_v54 = vmul.f32 %v337_v53, %v322_v46  ;;  %v512_v46 = vld [vmem:[#allocation2 + $0x3] ss:$8 sm:$0xf0] }
 0x3a4   :  { %v513_v47 = vor.u32 %v512_v46, %v511_v45 }
 0x3a5   :  { %v340_v55 = vpack.c.bf16 %v1530_v54, %v1530_v54 }
 0x3a7   :  { %351 = vrot.lane.b32.xlu1 %v340_v55, %s1401_s22 }
 0x419   :  { %v352_v56 = vpop.permute.xlu1 %351 }
 0x41a   :  { %1220 = vmatmul.mubr.msk.bf16.vlgmr.msra.gmra.mxu0 %vm270_vm9, %v352_v56 }
 0x41b   :  { %1232 = vmatpush3.bf16.msra.mxu0 %v1490_v22  ;;  %1235 = vmatprep.mubr.msk.bf16.mxu0 %vm1398_vm4, %v1397_v8 }
 0x41c   :  { %1233 = vmatprep.subr.bf16.mxu0 %v1397_v8 }
 0x41f   :  { %1234 = vmatpush3.bf16.msra.mxu0 %v1498_v23 }
 0x420   :  { %1247 = vmatprep.subr.bf16.mxu0 %v1397_v8 }
 0x4da   :  { %v390_v60 = vpop.f32.mrf.mxu0 }
 0x4db   :  { %v396_v61 = vadd.f32 %v390_v60, %v349_v59 }
 0x4dc   :  { %v1221_v62 = vpop.f32.mrf.mxu0 }
 0x4dd   :  { %v1127_v63 = vmul.f32 -1.442695, %v396_v61 }
 0x4de   :  { %v393_v0 = vpop.f32.mrf.mxu0 }
 0x4df   :  { %1311 = vpow2.f32 %v1127_v63 }
 0x4e0   :  { %v1222_v1 = vpop.f32.mrf.mxu0  ;;  %1313 = vtanh.f32 %v396_v61 }
 0x4ec   :  { %v1312_v2 = vpop.eup %1311 }
 0x4ed   :  { %v401_v3 = vadd.f32 1.0, %v1312_v2  ;;  %v1314_v4 = vpop.eup %1313 }
 0x4ef   :  { %1315 = vrcp.f32 %v401_v3 }
 0x4fc   :  { %v1316_v5 = vpop.eup %1315 }
 0x4fd   :  { %v404_v6 = vsel %vm1521_vm8, %v1314_v4, %v1316_v5 }
 0x4fe   :  { %407 = vrot.lane.b32.xlu0 %v404_v6, %s1400_s4  ;;  %v405_v10 = vmul.f32 %v404_v6, %v333_v51 }
 0x570   :  { %v408_v7 = vpop.permute.xlu0 %407 }
 0x571   :  { %v410_v9 = vmul.f32 %v408_v7, %v404_v6  ;;  %v594_v7 = vld [vmem:[#allocation2 + $0x4] ss:$8 sm:$0xf0] }
 0x573   :  { %412 = vrot.lane.b32.xlu1 %v410_v9, %s1401_s22 }
 0x5e5   :  { %v413_v11 = vpop.permute.xlu1 %412 }
 0x5e6   :  { %v415_v12 = vadd.f32 %v413_v11, %v405_v10 }
 0x5e8   :  { %1317 = vtanh.f32 %v415_v12 }
 0x5f5   :  { %v1318_v13 = vpop.eup %1317 }
 0x5f6   :  { %418 = vrot.lane.b32.xlu0 %v1318_v13, %s1400_s4 }
 0x668   :  { %v419_v14 = vpop.permute.xlu0 %418 }
 0x669   :  { %v1547_v15 = vmul.f32 %v419_v14, %v404_v6  ;;  %v593_v6 = vld [vmem:[#allocation2 + $0x4] ss:$8 sm:$0xf] }
 0x66a   :  { %v595_v9 = vor.u32 %v594_v7, %v593_v6 }
 0x66b   :  { %v422_v16 = vpack.c.bf16 %v1547_v15, %v1547_v15 }
 0x66d   :  { %433 = vrot.lane.b32.xlu1 %v422_v16, %s1401_s22 }
 0x6df   :  { %v434_v17 = vpop.permute.xlu1 %433 }
 0x6e0   :  { %1228 = vmatmul.mubr.msk.bf16.vlgmr.msra.gmra.mxu1 %vm270_vm9, %v434_v17 }
 0x6e1   :  { %1240 = vmatpush3.bf16.msra.mxu1 %v1490_v22  ;;  %1243 = vmatprep.mubr.msk.bf16.mxu1 %vm1398_vm4, %v1397_v8 }
 0x6e2   :  { %1241 = vmatprep.subr.bf16.mxu1 %v1397_v8 }
 0x6e5   :  { %1242 = vmatpush3.bf16.msra.mxu1 %v1498_v23 }
 0x6e6   :  { %1255 = vmatprep.subr.bf16.mxu1 %v1397_v8 }
 0x7a0   :  { %v472_v21 = vpop.f32.mrf.mxu1 }
 0x7a1   :  { %v478_v24 = vadd.f32 %v472_v21, %v431_v20 }
 0x7a2   :  { %v1229_v25 = vpop.f32.mrf.mxu1 }
 0x7a3   :  { %v1129_v26 = vmul.f32 -1.442695, %v478_v24 }
 0x7a4   :  { %v475_v27 = vpop.f32.mrf.mxu1 }
 0x7a5   :  { %1319 = vpow2.f32 %v1129_v26 }
 0x7a6   :  { %v1230_v28 = vpop.f32.mrf.mxu1  ;;  %1321 = vtanh.f32 %v478_v24 }
 0x7b2   :  { %v1320_v29 = vpop.eup %1319 }
 0x7b3   :  { %v483_v30 = vadd.f32 1.0, %v1320_v29  ;;  %v1322_v31 = vpop.eup %1321 }
 0x7b5   :  { %1323 = vrcp.f32 %v483_v30 }
 0x7c2   :  { %v1324_v32 = vpop.eup %1323 }
 0x7c3   :  { %v486_v33 = vsel %vm1521_vm8, %v1322_v31, %v1324_v32 }
 0x7c4   :  { %489 = vrot.lane.b32.xlu0 %v486_v33, %s1400_s4  ;;  %v487_v36 = vmul.f32 %v486_v33, %v415_v12 }
 0x836   :  { %v490_v34 = vpop.permute.xlu0 %489 }
 0x837   :  { %v492_v35 = vmul.f32 %v490_v34, %v486_v33  ;;  %v675_v34 = vld [vmem:[#allocation2 + $0x5] ss:$8 sm:$0xf] }
 0x839   :  { %494 = vrot.lane.b32.xlu1 %v492_v35, %s1401_s22  ;;  %v676_v35 = vld [vmem:[#allocation2 + $0x5] ss:$8 sm:$0xf0] }
 0x8ab   :  { %v495_v37 = vpop.permute.xlu1 %494 }
 0x8ac   :  { %v497_v38 = vadd.f32 %v495_v37, %v487_v36  ;;  %v677_v36 = vor.u32 %v676_v35, %v675_v34 }
 0x8ae   :  { %1325 = vtanh.f32 %v497_v38 }
 0x8bb   :  { %v1326_v39 = vpop.eup %1325 }
 0x8bc   :  { %500 = vrot.lane.b32.xlu0 %v1326_v39, %s1400_s4 }
 0x92e   :  { %v501_v40 = vpop.permute.xlu0 %500 }
 0x92f   :  { %v1564_v41 = vmul.f32 %v501_v40, %v486_v33 }
 0x931   :  { %v504_v42 = vpack.c.bf16 %v1564_v41, %v1564_v41 }
 0x933   :  { %515 = vrot.lane.b32.xlu1 %v504_v42, %s1401_s22 }
 0x9a5   :  { %v516_v44 = vpop.permute.xlu1 %515 }
 0x9a6   :  { %1236 = vmatmul.mubr.msk.bf16.vlgmr.msra.gmra.mxu0 %vm270_vm9, %v516_v44 }
 0x9a7   :  { %1248 = vmatpush3.bf16.msra.mxu0 %v1490_v22  ;;  %1251 = vmatprep.mubr.msk.bf16.mxu0 %vm1398_vm4, %v1397_v8 }
 0x9a8   :  { %1249 = vmatprep.subr.bf16.mxu0 %v1397_v8 }
 0x9ab   :  { %1250 = vmatpush3.bf16.msra.mxu0 %v1498_v23 }
 0x9ac   :  { %1263 = vmatprep.subr.bf16.mxu0 %v1397_v8 }
 0xa66   :  { %v554_v48 = vpop.f32.mrf.mxu0 }
 0xa67   :  { %v560_v49 = vadd.f32 %v554_v48, %v513_v47 }
 0xa68   :  { %v1237_v50 = vpop.f32.mrf.mxu0 }
 0xa69   :  { %v1131_v51 = vmul.f32 -1.442695, %v560_v49 }
 0xa6a   :  { %v557_v52 = vpop.f32.mrf.mxu0 }
 0xa6b   :  { %1327 = vpow2.f32 %v1131_v51 }
 0xa6c   :  { %v1238_v53 = vpop.f32.mrf.mxu0  ;;  %1329 = vtanh.f32 %v560_v49 }
 0xa78   :  { %v1328_v55 = vpop.eup %1327 }
 0xa79   :  { %v565_v56 = vadd.f32 1.0, %v1328_v55  ;;  %v1330_v57 = vpop.eup %1329 }
 0xa7b   :  { %1331 = vrcp.f32 %v565_v56 }
 0xa88   :  { %v1332_v58 = vpop.eup %1331 }
 0xa89   :  { %v568_v59 = vsel %vm1521_vm8, %v1330_v57, %v1332_v58 }
 0xa8a   :  { %571 = vrot.lane.b32.xlu0 %v568_v59, %s1400_s4  ;;  %v569_v62 = vmul.f32 %v568_v59, %v497_v38 }
 0xafc   :  { %v572_v60 = vpop.permute.xlu0 %571 }
 0xafd   :  { %v574_v61 = vmul.f32 %v572_v60, %v568_v59  ;;  %v758_v60 = vld [vmem:[#allocation2 + $0x6] ss:$8 sm:$0xf0] }
 0xaff   :  { %576 = vrot.lane.b32.xlu1 %v574_v61, %s1401_s22 }
 0xb71   :  { %v577_v63 = vpop.permute.xlu1 %576 }
 0xb72   :  { %v579_v0 = vadd.f32 %v577_v63, %v569_v62 }
 0xb74   :  { %1333 = vtanh.f32 %v579_v0 }
 0xb81   :  { %v1334_v1 = vpop.eup %1333 }
 0xb82   :  { %582 = vrot.lane.b32.xlu0 %v1334_v1, %s1400_s4 }
 0xbf4   :  { %v583_v2 = vpop.permute.xlu0 %582 }
 0xbf5   :  { %v1581_v3 = vmul.f32 %v583_v2, %v568_v59  ;;  %v757_v59 = vld [vmem:[#allocation2 + $0x6] ss:$8 sm:$0xf] }
 0xbf6   :  { %v759_v61 = vor.u32 %v758_v60, %v757_v59  ;;  %v1140_v59 = vld [vmem:[%s1692_s7] ss:$0 sm:$0xff]  ;;  %s1375_s7 = scalar_lea.vmem %s1105_s11, 256 }
 0xbf7   :  { %v586_v4 = vpack.c.bf16 %v1581_v3, %v1581_v3  ;;  %p1376_p0 = scmp.ne.s32.totalorder %s1105_s11, %s1375_s7  ;;  %p1381_p2 = scmp.lt.s32.totalorder %s1375_s7, %s1375_s7 }
 0xbf9   :  { %597 = vrot.lane.b32.xlu1 %v586_v4, %s1401_s22  ;;  %p1382_p3 = por %p1381_p2, %p1380_p1 }
 0xbfb   :  { %p1383_p4 = pnand %p1382_p3, %p1376_p0 }
 0xc6b   :  { %v598_v5 = vpop.permute.xlu1 %597 }
 0xc6c   :  { %1244 = vmatmul.mubr.msk.bf16.vlgmr.msra.gmra.mxu1 %vm270_vm9, %v598_v5 }
 0xc6d   :  { %1256 = vmatpush3.bf16.msra.mxu1 %v1490_v22  ;;  %1259 = vmatprep.mubr.msk.bf16.mxu1 %vm1398_vm4, %v1397_v8 }
 0xc6e   :  { %1257 = vmatprep.subr.bf16.mxu1 %v1397_v8 }
 0xc71   :  { %1258 = vmatpush3.bf16.msra.mxu1 %v1498_v23 }
 0xc72   :  { %1271 = vmatprep.subr.mxu1 %v1397_v8 }
 0xd2c   :  { %v636_v10 = vpop.f32.mrf.mxu1 }
 0xd2d   :  { %v642_v11 = vadd.f32 %v636_v10, %v595_v9 }
 0xd2e   :  { %v1245_v12 = vpop.f32.mrf.mxu1 }
 0xd2f   :  { %v1133_v13 = vmul.f32 -1.442695, %v642_v11 }
 0xd30   :  { %v639_v14 = vpop.f32.mrf.mxu1 }
 0xd31   :  { %1335 = vpow2.f32 %v1133_v13 }
 0xd32   :  { %v1246_v16 = vpop.f32.mrf.mxu1  ;;  %1337 = vtanh.f32 %v642_v11 }
 0xd3e   :  { %v1336_v17 = vpop.eup %1335 }
 0xd3f   :  { %v647_v18 = vadd.f32 1.0, %v1336_v17  ;;  %v1338_v19 = vpop.eup %1337 }
 0xd41   :  { %1339 = vrcp.f32 %v647_v18 }
 0xd4e   :  { %v1340_v20 = vpop.eup %1339 }
 0xd4f   :  { %v650_v21 = vsel %vm1521_vm8, %v1338_v19, %v1340_v20 }
 0xd50   :  { %653 = vrot.lane.b32.xlu0 %v650_v21, %s1400_s4  ;;  %v651_v26 = vmul.f32 %v650_v21, %v579_v0 }
 0xdc2   :  { %v654_v24 = vpop.permute.xlu0 %653 }
 0xdc3   :  { %v656_v25 = vmul.f32 %v654_v24, %v650_v21  ;;  %v839_v24 = vld [vmem:[#allocation2 + $0x7] ss:$8 sm:$0xf] }
 0xdc5   :  { %658 = vrot.lane.b32.xlu1 %v656_v25, %s1401_s22  ;;  %v840_v25 = vld [vmem:[#allocation2 + $0x7] ss:$8 sm:$0xf0] }
 0xe37   :  { %v659_v27 = vpop.permute.xlu1 %658 }
 0xe38   :  { %v661_v28 = vadd.f32 %v659_v27, %v651_v26  ;;  %v841_v26 = vor.u32 %v840_v25, %v839_v24 }
 0xe3a   :  { %1341 = vtanh.f32 %v661_v28 }
 0xe47   :  { %v1342_v29 = vpop.eup %1341 }
 0xe48   :  { %664 = vrot.lane.b32.xlu0 %v1342_v29, %s1400_s4 }
 0xeba   :  { %v665_v30 = vpop.permute.xlu0 %664 }
 0xebb   :  { %v1598_v31 = vmul.f32 %v665_v30, %v650_v21 }
 0xebd   :  { %v668_v32 = vpack.c.bf16 %v1598_v31, %v1598_v31 }
 0xebf   :  { %679 = vrot.lane.b32.xlu1 %v668_v32, %s1401_s22 }
 0xf31   :  { %v680_v33 = vpop.permute.xlu1 %679 }
 0xf32   :  { %1252 = vmatmul.mubr.msk.bf16.vlgmr.msra.gmra.mxu0 %vm270_vm9, %v680_v33 }
 0xf33   :  { %1264 = vmatpush3.bf16.msra.mxu0 %v1490_v22  ;;  %1267 = vmatprep.mubr.msk.bf16.mxu0 %vm1398_vm4, %v1397_v8 }
 0xf34   :  { %1265 = vmatprep.subr.bf16.mxu0 %v1397_v8 }
 0xf37   :  { %1266 = vmatpush3.bf16.msra.mxu0 %v1498_v23 }
 0xf38   :  { %1282 = vmatprep.subr.mxu0 %v1397_v8 }
 0xff2   :  { %v718_v37 = vpop.f32.mrf.mxu0 }
 0xff3   :  { %v724_v38 = vadd.f32 %v718_v37, %v677_v36 }
 0xff4   :  { %v1253_v39 = vpop.f32.mrf.mxu0 }
 0xff5   :  { %v1135_v40 = vmul.f32 -1.442695, %v724_v38 }
 0xff6   :  { %v721_v42 = vpop.f32.mrf.mxu0 }
 0xff7   :  { %1343 = vpow2.f32 %v1135_v40 }
 0xff8   :  { %v1254_v44 = vpop.f32.mrf.mxu0  ;;  %1345 = vtanh.f32 %v724_v38 }
0x1004   :  { %v1344_v22 = vpop.eup %1343 }
0x1005   :  { %v729_v45 = vadd.f32 1.0, %v1344_v22  ;;  %v1346_v46 = vpop.eup %1345 }
0x1007   :  { %1347 = vrcp.f32 %v729_v45 }
0x1014   :  { %v1348_v47 = vpop.eup %1347 }
0x1015   :  { %v732_v23 = vsel %vm1521_vm8, %v1346_v46, %v1348_v47  ;;  %v921_v47 = vld [vmem:[%s1691_s6 + $0x10] sm:$0xff] }
0x1016   :  { %735 = vrot.lane.b32.xlu0 %v732_v23, %s1400_s4  ;;  %v733_v50 = vmul.f32 %v732_v23, %v661_v28 }
0x1088   :  { %v736_v48 = vpop.permute.xlu0 %735 }
0x1089   :  { %v738_v49 = vmul.f32 %v736_v48, %v732_v23 }
0x108b   :  { %740 = vrot.lane.b32.xlu1 %v738_v49, %s1401_s22 }
0x10fd   :  { %v741_v51 = vpop.permute.xlu1 %740 }
0x10fe   :  { %v743_v52 = vadd.f32 %v741_v51, %v733_v50 }
0x1100   :  { %1349 = vtanh.f32 %v743_v52 }
0x110d   :  { %v1350_v53 = vpop.eup %1349 }
0x110e   :  { %746 = vrot.lane.b32.xlu0 %v1350_v53, %s1400_s4 }
0x1180   :  { %v747_v55 = vpop.permute.xlu0 %746 }
0x1181   :  { %v1615_v56 = vmul.f32 %v747_v55, %v732_v23 }
0x1183   :  { %v750_v57 = vpack.c.bf16 %v1615_v56, %v1615_v56 }
0x1185   :  { %761 = vrot.lane.b32.xlu1 %v750_v57, %s1401_s22 }
0x11f7   :  { %v762_v58 = vpop.permute.xlu1 %761 }
0x11f8   :  { %1260 = vmatmul.mubr.msk.bf16.vlgmr.msra.gmra.mxu1 %vm270_vm9, %v762_v58 }
0x11f9   :  { %1279 = vmatprep.mubr.msk.f32.mxu1 %vm1398_vm4, %v1397_v8 }
0x12b8   :  { %v800_v62 = vpop.f32.mrf.mxu1 }
0x12b9   :  { %v806_v63 = vadd.f32 %v800_v62, %v759_v61 }
0x12ba   :  { %v1261_v0 = vpop.f32.mrf.mxu1 }
0x12bb   :  { %v1137_v1 = vmul.f32 -1.442695, %v806_v63 }
0x12bc   :  { %v803_v2 = vpop.f32.mrf.mxu1 }
0x12bd   :  { %1351 = vpow2.f32 %v1137_v1 }
0x12be   :  { %v1262_v4 = vpop.f32.mrf.mxu1  ;;  %1353 = vtanh.f32 %v806_v63 }
0x12ca   :  { %v1352_v5 = vpop.eup %1351 }
0x12cb   :  { %v811_v6 = vadd.f32 1.0, %v1352_v5  ;;  %v1354_v7 = vpop.eup %1353 }
0x12cd   :  { %1355 = vrcp.f32 %v811_v6 }
0x12da   :  { %v1356_v9 = vpop.eup %1355 }
0x12db   :  { %v814_v10 = vsel %vm1521_vm8, %v1354_v7, %v1356_v9 }
0x12dc   :  { %817 = vrot.lane.b32.xlu0 %v814_v10, %s1400_s4  ;;  %v815_v13 = vmul.f32 %v814_v10, %v743_v52 }
0x134e   :  { %v818_v11 = vpop.permute.xlu0 %817 }
0x134f   :  { %v820_v12 = vmul.f32 %v818_v11, %v814_v10 }
0x1351   :  { %822 = vrot.lane.b32.xlu1 %v820_v12, %s1401_s22 }
0x13c3   :  { %v823_v14 = vpop.permute.xlu1 %822 }
0x13c4   :  { %v825_v16 = vadd.f32 %v823_v14, %v815_v13 }
0x13c6   :  { %1357 = vtanh.f32 %v825_v16 }
0x13d3   :  { %v1358_v17 = vpop.eup %1357 }
0x13d4   :  { %828 = vrot.lane.b32.xlu0 %v1358_v17, %s1400_s4 }
0x1446   :  { %v829_v18 = vpop.permute.xlu0 %828 }
0x1447   :  { %v831_v19 = vmul.f32 %v829_v18, %v814_v10 }
0x1449   :  { %v832_v20 = vpack.c.bf16 %v831_v19, %v831_v19 }
0x144b   :  { %843 = vrot.lane.b32.xlu1 %v832_v20, %s1401_s22 }
0x14bd   :  { %v844_v21 = vpop.permute.xlu1 %843 }
0x14be   :  { %1268 = vmatmul.mubr.msk.bf16.vlgmr.msra.gmra.mxu0 %vm270_vm9, %v844_v21 }
0x14bf   :  { %1290 = vmatprep.mubr.msk.f32.mxu0 %vm1398_vm4, %v1397_v8 }
0x157e   :  { %v882_v27 = vpop.f32.mrf.mxu0 }
0x157f   :  { %v888_v28 = vadd.f32 %v882_v27, %v841_v26 }
0x1580   :  { %v1269_v29 = vpop.f32.mrf.mxu0 }
0x1581   :  { %v1139_v30 = vmul.f32 -1.442695, %v888_v28 }
0x1582   :  { %v885_v32 = vpop.f32.mrf.mxu0 }
0x1583   :  { %1359 = vpow2.f32 %v1139_v30 }
0x1584   :  { %v1270_v33 = vpop.f32.mrf.mxu0  ;;  %1361 = vtanh.f32 %v888_v28 }
0x1590   :  { %v1360_v34 = vpop.eup %1359 }
0x1591   :  { %v893_v35 = vadd.f32 1.0, %v1360_v34  ;;  %v1362_v36 = vpop.eup %1361 }
0x1593   :  { %1363 = vrcp.f32 %v893_v35 }
0x15a0   :  { %v1364_v37 = vpop.eup %1363 }
0x15a1   :  { %v896_v38 = vsel %vm1521_vm8, %v1362_v36, %v1364_v37 }
0x15a2   :  { %899 = vrot.lane.b32.xlu0 %v896_v38, %s1400_s4  ;;  %v897_v42 = vmul.f32 %v896_v38, %v825_v16 }
0x1614   :  { %v900_v39 = vpop.permute.xlu0 %899 }
0x1615   :  { %v902_v40 = vmul.f32 %v900_v39, %v896_v38 }
0x1617   :  { %904 = vrot.lane.b32.xlu1 %v902_v40, %s1401_s22 }
0x161b   :  { %342 = vrot.lane.b32.xlu1 %v1530_v54, %s1401_s22 }
0x161f   :  { %506 = vrot.lane.b32.xlu1 %v1564_v41, %s1401_s22 }
0x1623   :  { %670 = vrot.lane.b32.xlu1 %v1598_v31, %s1401_s22  ;;  %v922_v31 = vld [vmem:[%s1691_s6 + $0x18] sm:$0xff] }
0x1624   :  { %1272 = vmatpush3.msra.mxu1 %v922_v31  ;;  %1283 = vmatpush3.msra.mxu0 %v922_v31 }
0x1625   :  { %1273 = vmatprep.subr.mxu1 %v1397_v8  ;;  %1284 = vmatprep.subr.mxu0 %v1397_v8 }
0x1626   :  { %1274 = vmatpush3.msra.mxu1 %v921_v47  ;;  %1285 = vmatpush3.msra.mxu0 %v921_v47 }
0x1627   :  { %834 = vrot.lane.b32.xlu1 %v831_v19, %s1401_s22  ;;  %1275 = vmatprep.subr.mxu1 %v1397_v8 }
0x1628   :  { %1286 = vmatprep.subr.mxu0 %v1397_v8 }
0x1689   :  { %v905_v43 = vpop.permute.xlu1 %904 }
0x168a   :  { %v907_v44 = vadd.f32 %v905_v43, %v897_v42 }
0x168c   :  { %1365 = vtanh.f32 %v907_v44 }
0x168d   :  { %v343_v22 = vpop.permute.xlu1 %342 }
0x168e   :  { %345 = vst.msk [vmem:[#allocation3] sm:$0xff] %vm270_vm9, %v343_v22 }
0x1691   :  { %v507_v45 = vpop.permute.xlu1 %506 }
0x1692   :  { %509 = vst.msk [vmem:[#allocation3 + $0x10] sm:$0xff] %vm270_vm9, %v507_v45 }
0x1695   :  { %v671_v46 = vpop.permute.xlu1 %670 }
0x1696   :  { %673 = vst.msk [vmem:[#allocation3 + $0x20] sm:$0xff] %vm270_vm9, %v671_v46 }
0x1699   :  { %v1366_v54 = vpop.eup %1365  ;;  %v835_v41 = vpop.permute.xlu1 %834 }
0x169a   :  { %837 = vst.msk [vmem:[#allocation3 + $0x30] sm:$0xff] %vm270_vm9, %v835_v41  ;;  %910 = vrot.lane.b32.xlu0 %v1366_v54, %s1400_s4 }
0x169e   :  { %424 = vrot.lane.b32.xlu0 %v1547_v15, %s1401_s22  ;;  %v920_v15 = vld [vmem:[%s1691_s6 + $0x8] sm:$0xff] }
0x169f   :  { %1276 = vmatpush3.msra.mxu1 %v920_v15  ;;  %1287 = vmatpush3.msra.mxu0 %v920_v15 }
0x16a0   :  { %1277 = vmatprep.subr.mxu1 %v1397_v8  ;;  %1288 = vmatprep.subr.mxu0 %v1397_v8 }
0x16a2   :  { %588 = vrot.lane.b32.xlu0 %v1581_v3, %s1401_s22  ;;  %v919_v3 = vld [vmem:[%s1691_s6] sm:$0xff] }
0x16a3   :  { %1278 = vmatpush3.msra.mxu1 %v919_v3  ;;  %1289 = vmatpush3.msra.mxu0 %v919_v3 }
0x16a6   :  { %752 = vrot.lane.b32.xlu0 %v1615_v56, %s1401_s22 }
0x170c   :  { %v911_v23 = vpop.permute.xlu0 %910 }
0x170d   :  { %v913_v48 = vmul.f32 %v911_v23, %v896_v38 }
0x170f   :  { %915 = vrot.lane.b32.xlu0 %v913_v48, %s1401_s22 }
0x1710   :  { %v425_v49 = vpop.permute.xlu0 %424 }
0x1711   :  { %427 = vst.msk [vmem:[#allocation3 + $0x8] sm:$0xff] %vm270_vm9, %v425_v49 }
0x1714   :  { %v589_v50 = vpop.permute.xlu0 %588 }
0x1715   :  { %591 = vst.msk [vmem:[#allocation3 + $0x18] sm:$0xff] %vm270_vm9, %v589_v50 }
0x1718   :  { %v753_v51 = vpop.permute.xlu0 %752 }
0x1719   :  { %755 = vst.msk [vmem:[#allocation3 + $0x28] sm:$0xff] %vm270_vm9, %v753_v51 }
0x171c   :  { %v924_v53 = vld [vmem:[#allocation3] ss:$8 sm:$0xf]  ;;  %v1015_v8 = vld [vmem:[#allocation3 + $0x1] ss:$8 sm:$0xf] }
0x1781   :  { %v916_v52 = vpop.permute.xlu0 %915 }
0x1782   :  { %918 = vst.msk [vmem:[#allocation3 + $0x38] sm:$0xff] %vm270_vm9, %v916_v52 }
0x1789   :  { %v925_v55 = vld [vmem:[#allocation3] ss:$8 sm:$0xf0]  ;;  %v1016_v56 = vld [vmem:[#allocation3 + $0x1] ss:$8 sm:$0xf0] }
0x178a   :  { %v926_v57 = vor.u32 %v925_v55, %v924_v53  ;;  %v1017_v58 = vor.u32 %v1016_v56, %v1015_v8 }
0x178c   :  { %1280 = vmatmul.mubr.msk.f32.vlgmr.msra.gmra.mxu1 %vm270_vm9, %v926_v57  ;;  %1291 = vmatmul.mubr.msk.f32.vlgmr.msra.gmra.mxu0 %vm270_vm9, %v1017_v58 }
0x184c   :  { %v1002_v60 = vpop.f32.mrf.mxu1  ;;  %v1087_v61 = vpop.f32.mrf.mxu0 }
0x184d   :  { %v1003_v62 = vadd.f32 %v1140_v59, %v1002_v60  ;;  %v1088_v63 = vadd.f32 %v1140_v59, %v1087_v61 }
0x184e   :  { %v1281_v0 = vpop.f32.mrf.mxu1  ;;  %v1292_v1 = vpop.f32.mrf.mxu0 }
0x184f   :  { %v1142_v2 = vmul.f32 -1.442695, %v1003_v62  ;;  %v1144_v4 = vmul.f32 -1.442695, %v1088_v63 }
0x1851   :  { %1367 = vpow2.f32 %v1142_v2 }
0x1852   :  { %1369 = vpow2.f32 %v1144_v4 }
0x185e   :  { %v1368_v5 = vpop.eup %1367 }
0x185f   :  { %v1370_v6 = vpop.eup %1369  ;;  %v1009_v7 = vadd.f32 1.0, %v1368_v5 }
0x1860   :  { %v1094_v9 = vadd.f32 1.0, %v1370_v6 }
0x1861   :  { %1371 = vrcp.f32 %v1009_v7 }
0x1862   :  { %1373 = vrcp.f32 %v1094_v9 }
0x186e   :  { %v1372_v10 = vpop.eup %1371 }
0x186f   :  { %v1374_v11 = vpop.eup %1373  ;;  %1013 = vst.msk [vmem:[#allocation4] sm:$0xff] %vm1012_vm10, %v1372_v10 }
0x1870   :  { %1098 = vst.msk [vmem:[#allocation4 + $0x8] sm:$0xff] %vm1012_vm10, %v1374_v11 }
0x1871   :  { %1386 = shalt.err (!%p1383_p4)
}
0x1872   :  { %s1403_s12 = smov 128   ;;  %s1404_s13 = smov 8  }
0x1873   :  { %1110 = dma.vmem_to_hbm [thread:$0]  %s1105_s11, 256, %s1693_s8, [#allocation5], %s1403_s12, %s1403_s12, %s1404_s13  }
0x1874   :  { %1395 = dma.done.wait [#allocation5], 256  }
0x1875   :  { %1396 = vsyncadd [#allocation5], 4294967040 }
0x1876   :  { %1114 = vsyncpa [#allocation5], 1 }

</bundles_post_ra>
